<compile_context>
chip_gen: v7x
topology: tpu7x:2x2x1
jax: 0.10.0
libtpu: 0.0.40
codegen_flags: <defaults>
</compile_context>

<pallas_src>
import functools

import jax
import jax.numpy as jnp
from jax.experimental import pallas as pl
from jax.experimental.pallas import tpu as pltpu


def _round_up(n, m):
    return ((n + m - 1) // m) * m


def dnn_kernel(x_ref, w1_ref, b1_ref, w2_ref, b2_ref, o_ref):
    # fc1: cast the f32 activation tile to bf16 in VMEM (MXU operands),
    # accumulate in f32, add bias, ReLU.
    x = x_ref[...].astype(jnp.bfloat16)                          # (bm, in_dim)
    h = jnp.dot(x, w1_ref[...], preferred_element_type=jnp.float32)
    h = jnp.maximum(h + b1_ref[...], 0.0)                        # (bm, mid_p)

    # fc2 (bf16 operands, f32 accumulation) + bias.
    logits = jnp.dot(h.astype(w2_ref.dtype), w2_ref[...],
                     preferred_element_type=jnp.float32)
    logits = logits + b2_ref[...]                                # (bm, out_dim)

    # Numerically-stable log_softmax over the last axis (exp/log -> EUP slot).
    m = jnp.max(logits, axis=-1, keepdims=True)
    shifted = logits - m
    lse = jnp.log(jnp.sum(jnp.exp(shifted), axis=-1, keepdims=True))
    o_ref[...] = (shifted - lse).astype(o_ref.dtype)
    # TODO(synk): optional v7x-only A/B — pad logits to 128 lanes (b2 pad = -1e30)
    # for unmasked vst; kept at 10 lanes here since it loses on v5e/v6e.


def prepare_dnn_params(w1, b1, w2, b2):
    """One-time (init-time) padding + bf16 cast of the parameters.

    w1: (input_dim, mid_dim), b1: (mid_dim,), w2: (mid_dim, output_dim), b2: (output_dim,)
    Returns (w1_p, b1_p, w2_p, b2_p) with mid_dim zero-padded to a multiple of 128,
    weights in bf16, biases in f32 as (1, n) rows.
    """
    input_dim, mid_dim = w1.shape
    output_dim = w2.shape[1]
    assert w2.shape[0] == mid_dim and b1.shape == (mid_dim,) and b2.shape == (output_dim,)

    mid_p = _round_up(mid_dim, 128)
    w1_p = jnp.zeros((input_dim, mid_p), jnp.bfloat16).at[:, :mid_dim].set(
        w1.astype(jnp.bfloat16))
    b1_p = jnp.zeros((1, mid_p), jnp.float32).at[0, :mid_dim].set(
        b1.astype(jnp.float32))
    w2_p = jnp.zeros((mid_p, output_dim), jnp.bfloat16).at[:mid_dim, :].set(
        w2.astype(jnp.bfloat16))
    b2_p = b2.reshape(1, output_dim).astype(jnp.float32)
    return w1_p, b1_p, w2_p, b2_p


@functools.partial(jax.jit, static_argnames=("block_b",))
def dnn_forward(x, w1_p, b1_p, w2_p, b2_p, *, block_b=1024):
    """x: (B, ...) flattened to (B, input_dim). Params from prepare_dnn_params.

    Returns (B, output_dim) float32 log-probabilities.
    """
    B = x.shape[0]
    x2d = x.reshape(B, -1)
    input_dim = x2d.shape[1]
    mid_p = w1_p.shape[1]
    output_dim = w2_p.shape[1]
    assert w1_p.shape[0] == input_dim
    assert w2_p.shape == (mid_p, output_dim)

    # ---- batch tiling ------------------------------------------------------
    if B <= block_b:
        bm = B                       # single full-extent tile: no row padding
    else:
        bm = block_b
    # v7x: make sure the "parallel" grid axis has >= 2 tiles so both
    # TensorCores get work (no-op on the single-core v5e/v6e).
    if B > 64 and pl.cdiv(B, bm) < 2:
        bm = _round_up(pl.cdiv(B, 2), 8)

    num_tiles = pl.cdiv(B, bm)
    b_p = num_tiles * bm
    if b_p != B:
        # Cheap row-only pad; padded rows give finite values and are sliced off.
        x2d = jnp.pad(x2d, ((0, b_p - B), (0, 0)))

    x_bytes = x2d.dtype.itemsize
    cost = pl.CostEstimate(
        flops=2 * b_p * (input_dim * mid_p + mid_p * output_dim),
        transcendentals=b_p * (output_dim + 1),
        bytes_accessed=(b_p * input_dim * x_bytes
                        + input_dim * mid_p * 2 + mid_p * 4
                        + mid_p * output_dim * 2 + output_dim * 4
                        + b_p * output_dim * 4),
    )

    out_padded = pl.pallas_call(
        dnn_kernel,
        out_shape=jax.ShapeDtypeStruct((b_p, output_dim), jnp.float32),
        grid=(num_tiles,),
        in_specs=[
            pl.BlockSpec((bm, input_dim), lambda i: (i, 0)),       # x tile (pipelined)
            pl.BlockSpec((input_dim, mid_p), lambda i: (0, 0)),    # W1 resident
            pl.BlockSpec((1, mid_p), lambda i: (0, 0)),            # b1 resident
            pl.BlockSpec((mid_p, output_dim), lambda i: (0, 0)),   # W2 resident
            pl.BlockSpec((1, output_dim), lambda i: (0, 0)),       # b2 resident
        ],
        out_specs=pl.BlockSpec((bm, output_dim), lambda i: (i, 0)),
        compiler_params=pltpu.CompilerParams(
            dimension_semantics=("parallel",)),  # batch tiles shard across v7x's 2 TCs
        cost_estimate=cost,
    )(x2d, w1_p, b1_p, w2_p, b2_p)

    return out_padded[:B]


def init_linear_params(key, in_features, out_features):
    """Deterministic init mimicking nn.Linear: U(-1/sqrt(fan_in), 1/sqrt(fan_in)).
    Weight stored as (in_features, out_features) — PyTorch weight transposed."""
    kw, kb = jax.random.split(key)
    bound = 1.0 / jnp.sqrt(in_features)
    w = jax.random.uniform(kw, (in_features, out_features), jnp.float32,
                           minval=-bound, maxval=bound)
    b = jax.random.uniform(kb, (out_features,), jnp.float32,
                           minval=-bound, maxval=bound)
    return w, b


if __name__ == "__main__":
    input_dim, mid_dim, output_dim = 784, 100, 10
    batch = 2

    key = jax.random.PRNGKey(0)
    kx, k1, k2 = jax.random.split(key, 3)

    # MNIST-like NCHW input that flattens to input_dim=784
    x = jax.random.normal(kx, (batch, 1, 28, 28), jnp.float32)

    w1, b1 = init_linear_params(k1, input_dim, mid_dim)
    w2, b2 = init_linear_params(k2, mid_dim, output_dim)

    # One-time parameter prep (hoisted out of the forward path).
    w1_p, b1_p, w2_p, b2_p = prepare_dnn_params(w1, b1, w2, b2)
    w1_p, b1_p, w2_p, b2_p = jax.block_until_ready((w1_p, b1_p, w2_p, b2_p))

    out = dnn_forward(x, w1_p, b1_p, w2_p, b2_p)
    out = jax.block_until_ready(out)
    assert out.shape == (batch, output_dim)

    # Reference 1: pure-JAX with the same bf16 operand casts the kernel uses.
    x2d = x.reshape(batch, -1)
    xb = x2d.astype(jnp.bfloat16)
    w1b = w1.astype(jnp.bfloat16)
    w2b = w2.astype(jnp.bfloat16)
    h = jnp.maximum(jnp.dot(xb, w1b, preferred_element_type=jnp.float32) + b1, 0.0)
    logits = jnp.dot(h.astype(jnp.bfloat16), w2b,
                     preferred_element_type=jnp.float32) + b2
    ref_bf16 = jax.nn.log_softmax(logits, axis=1)
    assert jnp.allclose(out, ref_bf16, atol=2e-3, rtol=2e-3), "mismatch vs bf16 reference"

    # Reference 2: full-f32 reference (looser tolerance covers bf16 cast error).
    hf = jnp.maximum(x2d @ w1 + b1, 0.0)
    ref_f32 = jax.nn.log_softmax(hf @ w2 + b2, axis=1)
    assert jnp.allclose(out, ref_f32, atol=5e-2), "mismatch vs f32 reference"

    # Also exercise a larger batch that triggers multi-tile + row padding.
    xb_big = jax.random.normal(kx, (300, 1, 28, 28), jnp.float32)
    out_big = jax.block_until_ready(dnn_forward(xb_big, w1_p, b1_p, w2_p, b2_p))
    hf_big = jnp.maximum(xb_big.reshape(300, -1) @ w1 + b1, 0.0)
    ref_big = jax.nn.log_softmax(hf_big @ w2 + b2, axis=1)
    assert out_big.shape == (300, output_dim)
    assert jnp.allclose(out_big, ref_big, atol=5e-2), "mismatch vs f32 reference (big batch)"

    print("KERNEL_OK")
</pallas_src>

<mosaic_0001>
module attributes {stable_mosaic.version = 11 : i64} {
  func.func @dnn_kernel(%arg0: i32, %arg1: memref<2x784xf32, #tpu.memory_space<vmem>>, %arg2: memref<784x128xbf16, #tpu.memory_space<vmem>>, %arg3: memref<1x128xf32, #tpu.memory_space<vmem>>, %arg4: memref<128x10xbf16, #tpu.memory_space<vmem>>, %arg5: memref<1x10xf32, #tpu.memory_space<vmem>>, %arg6: memref<2x10xf32, #tpu.memory_space<vmem>>) attributes {dimension_semantics = [#tpu.dimension_semantics<parallel>], iteration_bounds = array<i64: 1>, scalar_prefetch = 0 : i64, scratch_operands = 0 : i64, tpu.core_type = #tpu.core_type<tc>, window_params = [{transform_indices = @transform_0, window_bounds = array<i64: 2, 784>}, {pipeline_mode = #tpu.pipeline_mode<synchronous>, transform_indices = @transform_1, window_bounds = array<i64: 784, 128>}, {pipeline_mode = #tpu.pipeline_mode<synchronous>, transform_indices = @transform_2, window_bounds = array<i64: 1, 128>}, {pipeline_mode = #tpu.pipeline_mode<synchronous>, transform_indices = @transform_3, window_bounds = array<i64: 128, 10>}, {pipeline_mode = #tpu.pipeline_mode<synchronous>, transform_indices = @transform_4, window_bounds = array<i64: 1, 10>}, {transform_indices = @transform_5, window_bounds = array<i64: 2, 10>}]} {
    %c0 = arith.constant 0 : index
    %c0_0 = arith.constant 0 : index
    %0 = vector.load %arg1[%c0, %c0_0] : memref<2x784xf32, #tpu.memory_space<vmem>>, vector<2x784xf32>
    %1 = arith.truncf %0 : vector<2x784xf32> to vector<2x784xbf16>
    %c0_1 = arith.constant 0 : index
    %c0_2 = arith.constant 0 : index
    %2 = vector.load %arg2[%c0_1, %c0_2] : memref<784x128xbf16, #tpu.memory_space<vmem>>, vector<784x128xbf16>
    %cst = arith.constant dense<0.000000e+00> : vector<2x128xf32>
    %3 = tpu.matmul %1, %2, %cst {dimension_numbers = #tpu.dot_dimension_numbers<[1], [0], [0], [1], [0, 0, 1, 1], [], []>} : vector<2x784xbf16>, vector<784x128xbf16>, vector<2x128xf32> -> vector<2x128xf32>
    %c0_3 = arith.constant 0 : index
    %c0_4 = arith.constant 0 : index
    %4 = vector.load %arg3[%c0_3, %c0_4] : memref<1x128xf32, #tpu.memory_space<vmem>>, vector<1x128xf32>
    %5 = vector.broadcast %4 : vector<1x128xf32> to vector<2x128xf32>
    %6 = arith.addf %3, %5 : vector<2x128xf32>
    %cst_5 = arith.constant 0.000000e+00 : f32
    %7 = vector.broadcast %cst_5 : f32 to vector<2x128xf32>
    %8 = arith.maximumf %6, %7 : vector<2x128xf32>
    %9 = arith.truncf %8 : vector<2x128xf32> to vector<2x128xbf16>
    %c0_6 = arith.constant 0 : index
    %c0_7 = arith.constant 0 : index
    %10 = vector.load %arg4[%c0_6, %c0_7] : memref<128x10xbf16, #tpu.memory_space<vmem>>, vector<128x10xbf16>
    %cst_8 = arith.constant dense<0.000000e+00> : vector<2x10xf32>
    %11 = tpu.matmul %9, %10, %cst_8 {dimension_numbers = #tpu.dot_dimension_numbers<[1], [0], [0], [1], [0, 0, 1, 1], [], []>} : vector<2x128xbf16>, vector<128x10xbf16>, vector<2x10xf32> -> vector<2x10xf32>
    %c0_9 = arith.constant 0 : index
    %c0_10 = arith.constant 0 : index
    %12 = vector.load %arg5[%c0_9, %c0_10] : memref<1x10xf32, #tpu.memory_space<vmem>>, vector<1x10xf32>
    %13 = vector.broadcast %12 : vector<1x10xf32> to vector<2x10xf32>
    %14 = arith.addf %11, %13 : vector<2x10xf32>
    %cst_11 = arith.constant dense<0xFF800000> : vector<2xf32>
    %15 = vector.multi_reduction <maximumf>, %14, %cst_11 [1] : vector<2x10xf32> to vector<2xf32>
    %16 = vector.shape_cast %15 : vector<2xf32> to vector<2x1xf32>
    %17 = vector.broadcast %16 : vector<2x1xf32> to vector<2x10xf32>
    %18 = arith.subf %14, %17 : vector<2x10xf32>
    %19 = math.exp %18 : vector<2x10xf32>
    %cst_12 = arith.constant dense<0.000000e+00> : vector<2xf32>
    %20 = vector.multi_reduction <add>, %19, %cst_12 [1] : vector<2x10xf32> to vector<2xf32>
    %21 = vector.shape_cast %20 : vector<2xf32> to vector<2x1xf32>
    %22 = math.log %21 : vector<2x1xf32>
    %23 = vector.broadcast %22 : vector<2x1xf32> to vector<2x10xf32>
    %24 = arith.subf %18, %23 : vector<2x10xf32>
    %c0_13 = arith.constant 0 : index
    %c0_14 = arith.constant 0 : index
    %25 = vector.load %arg6[%c0_13, %c0_14] : memref<2x10xf32, #tpu.memory_space<vmem>>, vector<2x10xf32>
    tpu.vector_store %arg6[%c0_13, %c0_14], %24 {strides = array<i32>} : memref<2x10xf32, #tpu.memory_space<vmem>>, vector<2x10xf32>,
    return
  }
  func.func @transform_0(%arg0: i32) -> (i32, i32) {
    %c0_i32 = arith.constant 0 : i32
    %c0_i32_0 = arith.constant 0 : i32
    return %arg0, %c0_i32 : i32, i32
  }
  func.func @transform_1(%arg0: i32) -> (i32, i32) {
    %c0_i32 = arith.constant 0 : i32
    %c0_i32_0 = arith.constant 0 : i32
    %c0_i32_1 = arith.constant 0 : i32
    return %c0_i32, %c0_i32_0 : i32, i32
  }
  func.func @transform_2(%arg0: i32) -> (i32, i32) {
    %c0_i32 = arith.constant 0 : i32
    %c0_i32_0 = arith.constant 0 : i32
    %c0_i32_1 = arith.constant 0 : i32
    return %c0_i32, %c0_i32_0 : i32, i32
  }
  func.func @transform_3(%arg0: i32) -> (i32, i32) {
    %c0_i32 = arith.constant 0 : i32
    %c0_i32_0 = arith.constant 0 : i32
    %c0_i32_1 = arith.constant 0 : i32
    return %c0_i32, %c0_i32_0 : i32, i32
  }
  func.func @transform_4(%arg0: i32) -> (i32, i32) {
    %c0_i32 = arith.constant 0 : i32
    %c0_i32_0 = arith.constant 0 : i32
    %c0_i32_1 = arith.constant 0 : i32
    return %c0_i32, %c0_i32_0 : i32, i32
  }
  func.func @transform_5(%arg0: i32) -> (i32, i32) {
    %c0_i32 = arith.constant 0 : i32
    %c0_i32_0 = arith.constant 0 : i32
    return %arg0, %c0_i32 : i32, i32
  }
}

</mosaic_0001>

<bundles_post_ra>
// kernel: dnn_forward.1
= control target key start
LH: loop header
LB: loop body
LE: loop exit
PB: predicated region body
PF: predicated region fallthrough
CT: control target
= control target key end

     0   :  { %10 = vsyncpa [#allocation3], 0  ;;  %s1187_s0 = inlined_call_operand.vmem [shape: f32[2,784], index: 0, kind: input, shape index: {}]   ;;  %s1188_s1 = inlined_call_operand.hbm [shape: bf16[784,128], index: 1, kind: input, shape index: {}]   ;;  %s1189_s2 = inlined_call_operand.vmem [shape: f32[1,128], index: 2, kind: input, shape index: {}]   ;;  %s1190_s3 = inlined_call_operand.vmem [shape: bf16[128,10], index: 3, kind: input, shape index: {}]   ;;  %s1191_s4 = inlined_call_operand.vmem [shape: f32[1,10], index: 4, kind: input, shape index: {}]   ;;  %s1192_s5 = inlined_call_operand.hbm [shape: f32[2,10], index: 5, kind: output, shape index: {}]  }
   0x1   :  { %11 = vsyncpa [#allocation4], 0  ;;  %s1073_s18 = smov [#allocation2]   ;;  %s1025_s22 = scalar_lea.hbm %s1188_s1, 6272 }
   0x2   :  { %s19_s19 = sshll.u32 %s1073_s18, 4  ;;  %p1026_p0 = scmp.ne.s32.totalorder %s1188_s1, %s1025_s22  ;;  %s20_s19 = int_to_ptr.vmem [resolvable:$true] %s19_s19 }
   0x3   :  { %p1029_p1 = scmp.lt.u32.totalorder %s1025_s22, %s1188_s1 }
   0x5   :  { %p1031_p2 = pnand %p1029_p1, %p1026_p0 }
   0x7   :  { %1034 = shalt.err (!%p1031_p2)
}
   0x8   :  { %s1035_s27 = scalar_lea.vmem %s20_s19, 6272  ;;  %p1040_p4 = scmp.lt.s32.totalorder %s20_s19, %s20_s19 }
   0x9   :  { %p1036_p3 = scmp.ne.s32.totalorder %s20_s19, %s1035_s27  ;;  %p1041_p5 = scmp.lt.s32.totalorder %s1035_s27, %s1035_s27 }
   0xb   :  { %p1042_p6 = por %p1041_p5, %p1040_p4 }
   0xd   :  { %p1043_p7 = pnand %p1042_p6, %p1036_p3 }
   0xf   :  { %1046 = shalt.err (!%p1043_p7)
}
  0x10   :  { %s1074_s28 = smov 64   ;;  %s1075_s29 = smov 4  }
  0x11   :  { %25 = dma.hbm_to_vmem [thread:$0]  %s1188_s1, 6272, %s20_s19, [#allocation3], %s1074_s28, %s1074_s28, %s1075_s29  }
  0x12   :  { %1069 = dma.done.wait [#allocation3], 6272  }
  0x13   :  { %1070 = vsyncadd [#allocation3], 4294961024  ;;  %v962_v0 = vld [vmem:[#allocation2 + $0x40] sm:$0xff]   ;;  %v966_v4 = vld [vmem:[#allocation2 + $0x48] sm:$0xff]   ;;  %v1076_v21 = vmov 1983009808   ;;  %v44_v23 = vlaneseq }
  0x14   :  { %v963_v1 = vld [vmem:[#allocation2] sm:$0xff]   ;;  %852 = vmatprep.subr.bf16.mxu0 %v962_v0  ;;  %v967_v5 = vld [vmem:[#allocation2 + $0x8] sm:$0xff]   ;;  %v970_v8 = vld [vmem:[#allocation2 + $0x50] sm:$0xff]   ;;  %v42_v22 = vunpack.c.l.s4 %v1076_v21  ;;  %v1077_v45 = vmov 0.0   ;;  %vm1078_vm0 = vmmov 0   ;;  %vm486_vm1 = vcmask 130048  }
  0x15   :  { %v964_v2 = vld [vmem:[#allocation2 + $0xc0] sm:$0xff]   ;;  %853 = vmatpush3.bf16.msra.mxu0 %v963_v1  ;;  %v968_v6 = vld [vmem:[#allocation2 + $0xc8] sm:$0xff]   ;;  %v971_v9 = vld [vmem:[#allocation2 + $0x10] sm:$0xff]   ;;  %v45_v29 = vshrl.u32 %v44_v23, 7  ;;  %vm763_vm2 = vcmask 74752  }
  0x16   :  { %v965_v3 = vld [vmem:[#allocation2 + $0x80] sm:$0xff]   ;;  %874 = vmatprep.subr.bf16.mxu1 %v964_v2  ;;  %854 = vmatprep.subr.bf16.mxu0 %v966_v4  ;;  %v969_v7 = vld [vmem:[#allocation2 + $0x88] sm:$0xff]   ;;  %v972_v10 = vld [vmem:[#allocation2 + $0xd0] sm:$0xff]   ;;  %v43_v28 = vunpack.c.0.s8 %v42_v22 }
  0x17   :  { %875 = vmatpush3.bf16.msra.mxu1 %v965_v3  ;;  %v973_v11 = vld [vmem:[#allocation2 + $0x90] sm:$0xff]   ;;  %v974_v12 = vld [vmem:[#allocation2 + $0x58] sm:$0xff]   ;;  %v978_v16 = vld [vmem:[#allocation2 + $0x60] sm:$0xff]  }
  0x18   :  { %876 = vmatprep.subr.bf16.mxu1 %v968_v6  ;;  %v975_v13 = vld [vmem:[#allocation2 + $0x18] sm:$0xff]   ;;  %v979_v17 = vld [vmem:[#allocation2 + $0x20] sm:$0xff]   ;;  %v982_v20 = vld [vmem:[#allocation2 + $0x68] sm:$0xff]   ;;  %v46_v34 = vsub.s32 %v43_v28, %v45_v29 }
  0x19   :  { %855 = vmatpush3.bf16.msra.mxu0 %v967_v5  ;;  %v976_v14 = vld [vmem:[#allocation2 + $0xd8] sm:$0xff]   ;;  %v980_v18 = vld [vmem:[#allocation2 + $0xe0] sm:$0xff]   ;;  %v983_v24 = vld [vmem:[#allocation2 + $0x28] sm:$0xff]  }
  0x1a   :  { %856 = vmatprep.subr.bf16.mxu0 %v970_v8  ;;  %v977_v15 = vld [vmem:[#allocation2 + $0x98] sm:$0xff]   ;;  %v981_v19 = vld [vmem:[#allocation2 + $0xa0] sm:$0xff]   ;;  %v984_v25 = vld [vmem:[#allocation2 + $0xe8] sm:$0xff]  }
  0x1b   :  { %877 = vmatpush3.bf16.msra.mxu1 %v969_v7  ;;  %v985_v26 = vld [vmem:[#allocation2 + $0xa8] sm:$0xff]   ;;  %v986_v27 = vld [vmem:[#allocation2 + $0x70] sm:$0xff]   ;;  %v990_v33 = vld [vmem:[#allocation2 + $0x78] sm:$0xff]  }
  0x1c   :  { %878 = vmatprep.subr.bf16.mxu1 %v972_v10  ;;  %v987_v30 = vld [vmem:[#allocation2 + $0x30] sm:$0xff]   ;;  %v991_v35 = vld [vmem:[#allocation2 + $0x38] sm:$0xff]   ;;  %v36_v37 = vld [vmem:[%s1187_s0] sm:$0xff] }
  0x1d   :  { %857 = vmatpush3.bf16.msra.mxu0 %v971_v9  ;;  %v988_v31 = vld [vmem:[#allocation2 + $0xf0] sm:$0xff]   ;;  %v992_v36 = vld [vmem:[#allocation2 + $0xf8] sm:$0xff]   ;;  %v47_v38 = vrot.slane %v36_v37, %v46_v34  ;;  %v40_v40 = vcombine.high %v36_v37, %v36_v37  ;;  %v994_v41 = vld [vmem:[#allocation2 + $0x140] sm:$0xff]  }
  0x1e   :  { %858 = vmatprep.subr.bf16.mxu0 %v974_v12  ;;  %v989_v32 = vld [vmem:[#allocation2 + $0xb0] sm:$0xff]   ;;  %v993_v39 = vld [vmem:[#allocation2 + $0xb8] sm:$0xff]   ;;  %v996_v48 = vld [vmem:[#allocation2 + $0x100] sm:$0xff]  }
  0x1f   :  { %879 = vmatpush3.bf16.msra.mxu1 %v973_v11  ;;  %v55_v42 = vcombine.high %v47_v38, %v47_v38  ;;  %v54_v43 = vrot.slane %v40_v40, %v46_v34  ;;  %v80_v44 = vpack.c.bf16 %v47_v38, %v47_v38  ;;  %v997_v50 = vld [vmem:[#allocation2 + $0x148] sm:$0xff]   ;;  %v999_v53 = vld [vmem:[#allocation2 + $0x150] sm:$0xff]   ;;  %v1001_v55 = vld [vmem:[#allocation2 + $0x158] sm:$0xff]  }
  0x20   :  { %880 = vmatprep.subr.bf16.mxu1 %v976_v14  ;;  %v998_v52 = vld [vmem:[#allocation2 + $0x108] sm:$0xff]   ;;  %v1000_v54 = vld [vmem:[#allocation2 + $0x110] sm:$0xff]   ;;  %v1002_v56 = vld [vmem:[#allocation2 + $0x118] sm:$0xff]  }
  0x21   :  { %859 = vmatpush3.bf16.msra.mxu0 %v975_v13  ;;  %v81_v46 = vpack.c.bf16 %v55_v42, %v55_v42  ;;  %v56_v47 = vcombine.high %v54_v43, %v54_v43  ;;  %v82_v49 = vpack.c.bf16 %v54_v43, %v54_v43  ;;  %v1003_v57 = vld [vmem:[#allocation2 + $0x160] sm:$0xff]   ;;  %v37_v59 = vld [vmem:[%s1187_s0 + $0x8] sm:$0x3f]  ;;  %v1007_v5 = vld [vmem:[#allocation2 + $0x170] sm:$0xff]  }
  0x22   :  { %860 = vmatprep.subr.bf16.mxu0 %v978_v16  ;;  %v1011_v58 = vld [vmem:[#allocation2 + $0x180] sm:$0xff]   ;;  %v57_v61 = vcombine.high %v37_v59, %v37_v59  ;;  %v64_v62 = vrot.slane %v37_v59, %v46_v34  ;;  %v1005_v63 = vld [vmem:[#allocation2 + $0x168] sm:$0xff]   ;;  %v1008_v6 = vld [vmem:[#allocation2 + $0x130] sm:$0xff]  }
  0x23   :  { %881 = vmatpush3.bf16.msra.mxu1 %v977_v15  ;;  %522 = vmatprep.mubr.bf16.mxu0 %v81_v46  ;;  %v83_v51 = vpack.c.bf16 %v56_v47, %v56_v47  ;;  %v1004_v60 = vld [vmem:[#allocation2 + $0x120] sm:$0xff]   ;;  %v1006_v4 = vld [vmem:[#allocation2 + $0x128] sm:$0xff]   ;;  %v1009_v7 = vld [vmem:[#allocation2 + $0x178] sm:$0xff]  }
  0x24   :  { %882 = vmatprep.subr.bf16.mxu1 %v980_v18  ;;  %v71_v0 = vrot.slane %v57_v61, %v46_v34  ;;  %v72_v1 = vcombine.high %v64_v62, %v64_v62  ;;  %v1010_v8 = vld [vmem:[#allocation2 + $0x138] sm:$0xff]   ;;  %v84_v9 = vpack.c.bf16 %v64_v62, %v64_v62  ;;  %v1013_v10 = vld [vmem:[%s1190_s3] sm:$0xff]   ;;  %v1014_v11 = vld [vmem:[%s1190_s3 + $0x8] sm:$0xff]  }
  0x25   :  { %861 = vmatpush3.bf16.msra.mxu0 %v979_v17  ;;  %562 = vmatprep.mubr.bf16.mxu1 %v83_v51  ;;  %v1015_v12 = vld [vmem:[%s1190_s3 + $0x10] sm:$0xff]   ;;  %v1016_v13 = vld [vmem:[%s1190_s3 + $0x18] sm:$0xff]   ;;  %v1017_v14 = vld [vmem:[%s1190_s3 + $0x20] sm:$0xff]  }
  0x26   :  { %862 = vmatprep.subr.bf16.mxu0 %v982_v20  ;;  %v85_v2 = vpack.c.bf16 %v72_v1, %v72_v1  ;;  %v86_v3 = vpack.c.bf16 %v71_v0, %v71_v0  ;;  %v1018_v15 = vld [vmem:[%s1190_s3 + $0x28] sm:$0xff]   ;;  %v1019_v16 = vld [vmem:[%s1190_s3 + $0x30] sm:$0xff]   ;;  %v1020_v17 = vld [vmem:[%s1190_s3 + $0x38] sm:$0xff]  }
  0x27   :  { %883 = vmatpush3.bf16.msra.mxu1 %v981_v19  ;;  %v792_v19 = vld [vmem:[%s1189_s2] ss:$0 sm:$0xff] }
  0x28   :  { %884 = vmatprep.subr.bf16.mxu1 %v984_v25 }
  0x29   :  { %863 = vmatpush3.bf16.msra.mxu0 %v983_v24 }
  0x2a   :  { %864 = vmatprep.subr.bf16.mxu0 %v986_v27 }
  0x2b   :  { %885 = vmatpush3.bf16.msra.mxu1 %v985_v26 }
  0x2c   :  { %886 = vmatprep.subr.bf16.mxu1 %v988_v31 }
  0x2d   :  { %865 = vmatpush3.bf16.msra.mxu0 %v987_v30 }
  0x2e   :  { %866 = vmatprep.subr.bf16.mxu0 %v990_v33 }
  0x2f   :  { %887 = vmatpush3.bf16.msra.mxu1 %v989_v32 }
  0x30   :  { %888 = vmatprep.subr.bf16.mxu1 %v992_v36 }
  0x31   :  { %867 = vmatpush3.bf16.msra.mxu0 %v991_v35 }
  0x32   :  { %896 = vmatprep.subr.bf16.mxu0 %v994_v41 }
  0x33   :  { %889 = vmatpush3.bf16.msra.mxu1 %v993_v39 }
  0x34   :  { %929 = vmatprep.subr.bf16.mxu1 %v1077_v45  ;;  %523 = vmatmul.mubr.bf16.vlgmr.msra.gmra.mrb[0].mxu0 %v80_v44  ;;  %v843_v44 = vld [vmem:[%s1191_s4] ss:$0 sm:$0xff]  ;;  %s1079_s4 = smov [#allocation5]  }
  0x35   :  { %897 = vmatpush3.bf16.msra.mxu0 %v996_v48  ;;  %602 = vmatprep.mubr.bf16.mxu0 %v85_v2  ;;  %s783_s27 = sshll.u32 %s1079_s4, 4  ;;  %s784_s27 = int_to_ptr.vmem [resolvable:$true] %s783_s27 }
  0x36   :  { %563 = vmatmul.mubr.bf16.vlgmr.msra.gmra.mrb[0].mxu1 %v82_v49  ;;  %898 = vmatprep.subr.bf16.mxu0 %v997_v50  ;;  %s1047_s28 = scalar_lea.vmem %s784_s27, 32  ;;  %p1052_p9 = scmp.lt.s32.totalorder %s784_s27, %s784_s27 }
  0x37   :  { %931 = vmatprep.mubr.msk.bf16.mxu1 %vm1078_vm0, %v1077_v45  ;;  %930 = vmatpush3.bf16.msra.mxu1 %v1011_v58  ;;  %p1048_p8 = scmp.ne.s32.totalorder %s784_s27, %s1047_s28  ;;  %p1053_p10 = scmp.lt.s32.totalorder %s1047_s28, %s1047_s28 }
  0x38   :  { %935 = vmatprep.subr.bf16.mxu1 %v1077_v45 }
  0x39   :  { %899 = vmatpush3.bf16.msra.mxu0 %v998_v52  ;;  %p1054_p11 = por %p1053_p10, %p1052_p9 }
  0x3a   :  { %900 = vmatprep.subr.bf16.mxu0 %v999_v53 }
  0x3b   :  { %p1055_p12 = pnand %p1054_p11, %p1048_p8 }
  0x3d   :  { %901 = vmatpush3.bf16.msra.mxu0 %v1000_v54 }
  0x3e   :  { %902 = vmatprep.subr.bf16.mxu0 %v1001_v55  ;;  %932 = vmatmul.mubr.msk.bf16.vlgmr.msra.gmra.mrb[4].mxu1 %vm486_vm1, %v86_v3 }
  0x3f   :  { %951 = vmatprep.mubr.msk.bf16.mxu1 %vm1078_vm0, %v1077_v45  ;;  %936 = vmatpush3.bf16.msra.mxu1 %v1013_v10 }
  0x40   :  { %937 = vmatprep.subr.bf16.mxu1 %v1077_v45 }
  0x41   :  { %903 = vmatpush3.bf16.msra.mxu0 %v1002_v56 }
  0x42   :  { %904 = vmatprep.subr.bf16.mxu0 %v1003_v57 }
  0x43   :  { %938 = vmatpush3.bf16.msra.mxu1 %v1014_v11 }
  0x44   :  { %939 = vmatprep.subr.bf16.mxu1 %v1077_v45 }
  0x45   :  { %905 = vmatpush3.bf16.msra.mxu0 %v1004_v60 }
  0x46   :  { %906 = vmatprep.subr.bf16.mxu0 %v1005_v63 }
  0x47   :  { %940 = vmatpush3.bf16.msra.mxu1 %v1015_v12 }
  0x48   :  { %941 = vmatprep.subr.bf16.mxu1 %v1077_v45 }
  0x49   :  { %907 = vmatpush3.bf16.msra.mxu0 %v1006_v4 }
  0x4a   :  { %908 = vmatprep.subr.bf16.mxu0 %v1007_v5 }
  0x4b   :  { %942 = vmatpush3.bf16.msra.mxu1 %v1016_v13 }
  0x4c   :  { %943 = vmatprep.subr.bf16.mxu1 %v1077_v45 }
  0x4d   :  { %909 = vmatpush3.bf16.msra.mxu0 %v1008_v6 }
  0x4e   :  { %910 = vmatprep.subr.bf16.mxu0 %v1009_v7 }
  0x4f   :  { %944 = vmatpush3.bf16.msra.mxu1 %v1017_v14 }
  0x50   :  { %945 = vmatprep.subr.bf16.mxu1 %v1077_v45 }
  0x51   :  { %911 = vmatpush3.bf16.msra.mxu0 %v1010_v8 }
  0x53   :  { %946 = vmatpush3.bf16.msra.mxu1 %v1018_v15 }
  0x54   :  { %603 = vmatmul.mubr.bf16.vlgmr.msra.gmra.mrb[4].mxu0 %v84_v9  ;;  %947 = vmatprep.subr.bf16.mxu1 %v1077_v45 }
  0x57   :  { %948 = vmatpush3.bf16.msra.mxu1 %v1019_v16 }
  0x58   :  { %949 = vmatprep.subr.bf16.mxu1 %v1077_v45 }
  0x5b   :  { %950 = vmatpush3.bf16.msra.mxu1 %v1020_v17 }
 0x107   :  { %v868_v18 = vpop.f32.mrb[0].mxu0 }
 0x108   :  { %v869_v20 = vpop.f32.mrb[1].mxu0 }
 0x109   :  { %v870_v21 = vadd.f32 %v869_v20, %v868_v18  ;;  %v871_v22 = vpop.f32.mrb[2].mxu0  ;;  %v890_v23 = vpop.f32.mrb[0].mxu1 }
 0x10a   :  { %v872_v24 = vpop.f32.mrb[3].mxu0  ;;  %v891_v25 = vpop.f32.mrb[1].mxu1 }
 0x10b   :  { %v525_v26 = vadd.f32 %v870_v21, %v792_v19  ;;  %v892_v27 = vadd.f32 %v891_v25, %v890_v23  ;;  %v893_v28 = vpop.f32.mrb[2].mxu1 }
 0x10c   :  { %v894_v29 = vpop.f32.mrb[3].mxu1 }
 0x10d   :  { %v565_v30 = vadd.f32 %v892_v27, %v525_v26 }
 0x111   :  { %v644_v31 = vpop.f32.mrb[4].mxu1 }
 0x112   :  { %v933_v32 = vpop.f32.mrb[5].mxu1 }
 0x113   :  { %v647_v33 = vpop.f32.mrb[6].mxu1 }
 0x114   :  { %v934_v34 = vpop.f32.mrb[7].mxu1 }
 0x127   :  { %v912_v35 = vpop.f32.mrb[4].mxu0 }
 0x128   :  { %v913_v36 = vpop.f32.mrb[5].mxu0 }
 0x129   :  { %v914_v37 = vadd.f32 %v913_v36, %v912_v35  ;;  %v915_v38 = vpop.f32.mrb[6].mxu0 }
 0x12a   :  { %v916_v39 = vpop.f32.mrb[7].mxu0 }
 0x12b   :  { %v605_v40 = vadd.f32 %v914_v37, %v565_v30 }
 0x12d   :  { %v645_v41 = vadd.f32 %v644_v31, %v605_v40 }
 0x12f   :  { %v650_v42 = vmax.f32 %v645_v41, 0.0 }
 0x131   :  { %v651_v43 = vpack.c.bf16 %v650_v42, %v650_v42 }
 0x133   :  { %952 = vmatmul.mubr.bf16.vlgmr.msra.gmra.mrb[8].mxu1 %v651_v43 }
 0x206   :  { %v757_v45 = vpop.f32.mrb[8].mxu1 }
 0x207   :  { %v758_v46 = vadd.f32 %v843_v44, %v757_v45  ;;  %v953_v47 = vpop.f32.mrb[9].mxu1 }
 0x208   :  { %v760_v48 = vpop.f32.mrb[10].mxu1 }
 0x209   :  { %v954_v49 = vpop.f32.mrb[11].mxu1  ;;  %v764_v50 = vsel %vm763_vm2, %v758_v46, -inf }
 0x20a   :  { %765 = vmax.xlane.f32.xlu0 %v764_v50 }
 0x297   :  { %v766_v51 = vpop.xlane.xlu0 %765 }
 0x298   :  { %v767_v52 = vsub.f32 %v758_v46, %v766_v51 }
 0x29a   :  { %v768_v53 = vmul.f32 1.442695, %v767_v52 }
 0x29c   :  { %1021 = vpow2.f32 %v768_v53 }
 0x2a6   :  { %v1022_v54 = vpop.eup %1021 }
 0x2a7   :  { %v770_v55 = vsel %vm763_vm2, %v1022_v54, 0.0 }
 0x2a8   :  { %771 = vadd.xlane.f32.xlu0 %v770_v55 }
 0x335   :  { %v772_v56 = vpop.xlane.xlu0 %771 }
 0x336   :  { %1023 = vlog2.f32 %v772_v56 }
 0x340   :  { %v1024_v57 = vpop.eup %1023 }
 0x341   :  { %v774_v58 = vmul.f32 0.6931472, %v1024_v57 }
 0x343   :  { %v775_v59 = vsub.f32 %v767_v52, %v774_v58 }
 0x345   :  { %776 = vst.msk [vmem:[#allocation5] sm:$0x3] %vm763_vm2, %v775_v59 }
 0x346   :  { %1058 = shalt.err (!%p1055_p12)
}
 0x347   :  { %s1059_s6 = scalar_lea.hbm %s1192_s5, 32 }
 0x348   :  { %p1060_p13 = scmp.ne.s32.totalorder %s1192_s5, %s1059_s6  ;;  %p1063_p0 = scmp.lt.u32.totalorder %s1059_s6, %s1192_s5 }
 0x34a   :  { %p1065_p1 = pnand %p1063_p0, %p1060_p13 }
 0x34c   :  { %1068 = shalt.err (!%p1065_p1)
}
 0x34d   :  { %786 = dma.vmem_to_hbm [thread:$0]  %s784_s27, 32, %s1192_s5, [#allocation4]  }
 0x34e   :  { %1071 = dma.done.wait [#allocation4], 32  }
 0x34f   :  { %1072 = vsyncadd [#allocation4], 4294967264 }
 0x350   :  { %790 = vsyncpa [#allocation3], 1 }
 0x351   :  { %791 = vsyncpa [#allocation4], 1 }

</bundles_post_ra>
